<compile_context>
chip_gen: v7x
topology: tpu7x:2x2x1
jax: 0.10.0
libtpu: 0.0.40
codegen_flags: <defaults>
</compile_context>

<pallas_src>
import jax
import jax.numpy as jnp
from jax.experimental import pallas as pl
from jax.experimental.pallas import tpu as pltpu


def _residual_linear_kernel(x_ref, xres_ref, w_ref, b_ref, o_ref, acc_ref):
    # x_ref:    (tm, tk)  block (i, k)  -- matmul LHS tile
    # xres_ref: (tm, tn)  block (i, j)  -- residual tile (same layout as out)
    # w_ref:    (tk, tn)  block (k, j)  -- matmul RHS tile
    # b_ref:    (1,  tn)  block (0, j)  -- bias tile
    # o_ref:    (tm, tn)  block (i, j)  -- output tile
    # acc_ref:  (tm, tn)  f32 VMEM accumulator (resident across the K axis)
    k = pl.program_id(2)

    @pl.when(k == 0)
    def _init():
        acc_ref[...] = jnp.zeros_like(acc_ref)

    acc_ref[...] += jnp.dot(
        x_ref[...], w_ref[...], preferred_element_type=jnp.float32
    )

    @pl.when(k == pl.num_programs(2) - 1)
    def _finalize():
        # Bias + residual only once per output tile (VPU work is free under
        # an MXU-bound loop); all epilogue math in f32, downcast at the end.
        out = acc_ref[...] + b_ref[...].astype(jnp.float32)
        out = out + xres_ref[...].astype(jnp.float32)
        o_ref[...] = out.astype(o_ref.dtype)


def residual_linear(x, w, b, *, tm=128, tn=128, tk=128, matmul_dtype=None):
    """out = x + (x @ w + b), fused in a single tiled Pallas kernel.

    x: (M, H), w: (H, H), b: (H,).
    matmul_dtype: optionally cast x/w to e.g. jnp.bfloat16 for the MXU
      (v6e/v7x); accumulation, bias and residual stay in f32.
    """
    M, H = x.shape
    assert w.shape == (H, H) and b.shape == (H,)

    # Fall back to full-extent blocks when a dimension does not tile evenly
    # (allowed by the (8,128) rule when block == full array dim).
    tm = tm if M % tm == 0 else M
    tn = tn if H % tn == 0 else H
    tk = tk if H % tk == 0 else H

    if matmul_dtype is not None:
        x_mm = x.astype(matmul_dtype)
        w_mm = w.astype(matmul_dtype)
    else:
        x_mm, w_mm = x, w

    b2 = b.reshape(1, H)
    grid = (M // tm, H // tn, H // tk)

    itemsize = jnp.dtype(x.dtype).itemsize
    mm_itemsize = jnp.dtype(x_mm.dtype).itemsize
    cost = pl.CostEstimate(
        flops=2 * M * H * H,
        transcendentals=0,
        bytes_accessed=(
            M * H * mm_itemsize            # x (matmul view)
            + M * H * itemsize             # x (residual view)
            + (M // tm) * H * H * mm_itemsize  # W streamed once per row-block
            + H * 4                        # bias
            + M * H * itemsize             # output writeback
        ),
    )

    return pl.pallas_call(
        _residual_linear_kernel,
        out_shape=jax.ShapeDtypeStruct((M, H), x.dtype),
        grid_spec=pltpu.PrefetchScalarGridSpec(
            num_scalar_prefetch=0,
            grid=grid,
            in_specs=[
                pl.BlockSpec((tm, tk), lambda i, j, k: (i, k)),  # x for matmul
                pl.BlockSpec((tm, tn), lambda i, j, k: (i, j)),  # x for residual
                pl.BlockSpec((tk, tn), lambda i, j, k: (k, j)),  # w
                pl.BlockSpec((1, tn), lambda i, j, k: (0, j)),   # bias
            ],
            out_specs=pl.BlockSpec((tm, tn), lambda i, j, k: (i, j)),
            scratch_shapes=[pltpu.VMEM((tm, tn), jnp.float32)],
        ),
        compiler_params=pltpu.CompilerParams(
            dimension_semantics=("parallel", "parallel", "arbitrary"),
            # Raise above the 16/32 MiB scoped default but stay well inside
            # v7x's 64 MiB physical VMEM.
            vmem_limit_bytes=48 * 1024 * 1024,
        ),
        cost_estimate=cost,
    )(x_mm, x, w_mm, b2)
    # NOTE: input_output_aliases is intentionally NOT used: the output tile
    # (i, j) would clobber x columns still needed as matmul LHS blocks for
    # later j / k iterations of the same row block.


def residual_forward(x, w, b, *, matmul_dtype=None):
    """Residual(fn=Linear(H, H)) forward.  x: (batch, seq, hidden)."""
    # TODO(synk): Residual wraps an arbitrary fn; only the Linear case is
    # lowered here — other fns would need their own fused kernel.
    B, S, H = x.shape
    out = residual_linear(x.reshape(B * S, H), w, b, matmul_dtype=matmul_dtype)
    return out.reshape(B, S, H)


if __name__ == "__main__":
    key = jax.random.PRNGKey(0)
    kx, kw, kb = jax.random.split(key, 3)

    # Lane-aligned demo shapes: hidden is a multiple of 128 so output stores
    # are unmasked and the MXU columns are fully used; M = batch*seq = 128.
    batch, seq, hidden = 2, 64, 256
    x = jax.random.normal(kx, (batch, seq, hidden), dtype=jnp.float32)
    # Deterministic "Linear(hidden, hidden)" parameters.
    w = jax.random.normal(kw, (hidden, hidden), dtype=jnp.float32) * 0.05
    b = jax.random.normal(kb, (hidden,), dtype=jnp.float32) * 0.01

    out = jax.block_until_ready(residual_forward(x, w, b))

    # Reference check against plain JAX: x + (x @ w + b)
    ref = x + (jnp.einsum("bsh,hd->bsd", x, w) + b)
    assert out.shape == x.shape
    assert jnp.allclose(out, ref, atol=1e-3, rtol=1e-3), "mismatch vs reference"

    print("KERNEL_OK")
</pallas_src>

<mosaic_0001>
module attributes {stable_mosaic.version = 11 : i64} {
  func.func @_residual_linear_kernel(%arg0: i32, %arg1: i32, %arg2: i32, %arg3: memref<128x128xf32, #tpu.memory_space<vmem>>, %arg4: memref<128x128xf32, #tpu.memory_space<vmem>>, %arg5: memref<128x128xf32, #tpu.memory_space<vmem>>, %arg6: memref<1x128xf32, #tpu.memory_space<vmem>>, %arg7: memref<128x128xf32, #tpu.memory_space<vmem>>, %arg8: memref<128x128xf32, #tpu.memory_space<vmem>>) attributes {dimension_semantics = [#tpu.dimension_semantics<parallel>, #tpu.dimension_semantics<parallel>, #tpu.dimension_semantics<arbitrary>], iteration_bounds = array<i64: 1, 2, 2>, scalar_prefetch = 0 : i64, scratch_operands = 1 : i64, tpu.core_type = #tpu.core_type<tc>, window_params = [{transform_indices = @transform_0, window_bounds = array<i64: 128, 128>}, {transform_indices = @transform_1, window_bounds = array<i64: 128, 128>}, {transform_indices = @transform_2, window_bounds = array<i64: 128, 128>}, {transform_indices = @transform_3, window_bounds = array<i64: 1, 128>}, {transform_indices = @transform_4, window_bounds = array<i64: 128, 128>}]} {
    %c0_i32 = arith.constant 0 : i32
    %0 = arith.cmpi eq, %arg2, %c0_i32 : i32
    %1 = arith.extui %0 : i1 to i32
    %c0_i32_0 = arith.constant 0 : i32
    %2 = arith.cmpi ne, %1, %c0_i32_0 : i32
    scf.if %2 {
      %cst_9 = arith.constant 0.000000e+00 : f32
      %12 = vector.broadcast %cst_9 : f32 to vector<128x128xf32>
      %c0_10 = arith.constant 0 : index
      %c0_11 = arith.constant 0 : index
      %13 = vector.load %arg8[%c0_10, %c0_11] : memref<128x128xf32, #tpu.memory_space<vmem>>, vector<128x128xf32>
      tpu.vector_store %arg8[%c0_10, %c0_11], %12 {strides = array<i32>} : memref<128x128xf32, #tpu.memory_space<vmem>>, vector<128x128xf32>,
    } else {
    }
    %c0 = arith.constant 0 : index
    %c0_1 = arith.constant 0 : index
    %3 = vector.load %arg8[%c0, %c0_1] : memref<128x128xf32, #tpu.memory_space<vmem>>, vector<128x128xf32>
    %c0_2 = arith.constant 0 : index
    %c0_3 = arith.constant 0 : index
    %4 = vector.load %arg3[%c0_2, %c0_3] : memref<128x128xf32, #tpu.memory_space<vmem>>, vector<128x128xf32>
    %c0_4 = arith.constant 0 : index
    %c0_5 = arith.constant 0 : index
    %5 = vector.load %arg5[%c0_4, %c0_5] : memref<128x128xf32, #tpu.memory_space<vmem>>, vector<128x128xf32>
    %cst = arith.constant dense<0.000000e+00> : vector<128x128xf32>
    %6 = tpu.matmul %4, %5, %cst {dimension_numbers = #tpu.dot_dimension_numbers<[1], [0], [0], [1], [0, 0, 1, 1], [], []>} : vector<128x128xf32>, vector<128x128xf32>, vector<128x128xf32> -> vector<128x128xf32>
    %7 = arith.addf %3, %6 : vector<128x128xf32>
    %c0_6 = arith.constant 0 : index
    %c0_7 = arith.constant 0 : index
    %8 = vector.load %arg8[%c0_6, %c0_7] : memref<128x128xf32, #tpu.memory_space<vmem>>, vector<128x128xf32>
    tpu.vector_store %arg8[%c0_6, %c0_7], %7 {strides = array<i32>} : memref<128x128xf32, #tpu.memory_space<vmem>>, vector<128x128xf32>,
    %c1_i32 = arith.constant 1 : i32
    %9 = arith.cmpi eq, %arg2, %c1_i32 : i32
    %10 = arith.extui %9 : i1 to i32
    %c0_i32_8 = arith.constant 0 : i32
    %11 = arith.cmpi ne, %10, %c0_i32_8 : i32
    scf.if %11 {
      %c0_9 = arith.constant 0 : index
      %c0_10 = arith.constant 0 : index
      %12 = vector.load %arg8[%c0_9, %c0_10] : memref<128x128xf32, #tpu.memory_space<vmem>>, vector<128x128xf32>
      %c0_11 = arith.constant 0 : index
      %c0_12 = arith.constant 0 : index
      %13 = vector.load %arg6[%c0_11, %c0_12] : memref<1x128xf32, #tpu.memory_space<vmem>>, vector<1x128xf32>
      %14 = vector.broadcast %13 : vector<1x128xf32> to vector<128x128xf32>
      %15 = arith.addf %12, %14 : vector<128x128xf32>
      %c0_13 = arith.constant 0 : index
      %c0_14 = arith.constant 0 : index
      %16 = vector.load %arg4[%c0_13, %c0_14] : memref<128x128xf32, #tpu.memory_space<vmem>>, vector<128x128xf32>
      %17 = arith.addf %15, %16 : vector<128x128xf32>
      %c0_15 = arith.constant 0 : index
      %c0_16 = arith.constant 0 : index
      %18 = vector.load %arg7[%c0_15, %c0_16] : memref<128x128xf32, #tpu.memory_space<vmem>>, vector<128x128xf32>
      tpu.vector_store %arg7[%c0_15, %c0_16], %17 {strides = array<i32>} : memref<128x128xf32, #tpu.memory_space<vmem>>, vector<128x128xf32>,
    } else {
    }
    return
  }
  func.func @transform_0(%arg0: i32, %arg1: i32, %arg2: i32) -> (i32, i32) {
    %c0_i32 = arith.constant 0 : i32
    return %arg0, %arg2 : i32, i32
  }
  func.func @transform_1(%arg0: i32, %arg1: i32, %arg2: i32) -> (i32, i32) {
    %c0_i32 = arith.constant 0 : i32
    return %arg0, %arg1 : i32, i32
  }
  func.func @transform_2(%arg0: i32, %arg1: i32, %arg2: i32) -> (i32, i32) {
    %c0_i32 = arith.constant 0 : i32
    return %arg2, %arg1 : i32, i32
  }
  func.func @transform_3(%arg0: i32, %arg1: i32, %arg2: i32) -> (i32, i32) {
    %c0_i32 = arith.constant 0 : i32
    %c0_i32_0 = arith.constant 0 : i32
    return %c0_i32, %arg1 : i32, i32
  }
  func.func @transform_4(%arg0: i32, %arg1: i32, %arg2: i32) -> (i32, i32) {
    %c0_i32 = arith.constant 0 : i32
    return %arg0, %arg1 : i32, i32
  }
}

</mosaic_0001>

<bundles_post_ra>
// kernel: tpu_custom_call.1
= control target key start
LH: loop header
LB: loop body
LE: loop exit
PB: predicated region body
PF: predicated region fallthrough
CT: control target
= control target key end

     0   :  { %s1950_s0 = inlined_call_operand.hbm [shape: f32[128,256], index: 0, kind: input, shape index: {}]   ;;  %s1951_s1 = inlined_call_operand.hbm [shape: f32[128,256], index: 1, kind: input, shape index: {}]   ;;  %s1952_s2 = inlined_call_operand.hbm [shape: f32[256,256], index: 2, kind: input, shape index: {}]   ;;  %s1953_s3 = inlined_call_operand.vmem [shape: f32[1,256], index: 3, kind: input, shape index: {}]   ;;  %s1954_s4 = inlined_call_operand.hbm [shape: f32[128,256], index: 4, kind: output, shape index: {}]  }
   0x1   :  { %1979 = sst [smem:[#allocation23_spill]] %s1950_s0 }
   0x2   :  { %1980 = sst [smem:[#allocation24_spill]] %s1951_s1 }
   0x3   :  { %1981 = sst [smem:[#allocation25_spill]] %s1953_s3 }
   0x4   :  { %1982 = sst [smem:[#allocation26_spill]] %s1954_s4 }
   0x5   :  { %9 = vsyncpa [#allocation4], 0 }
   0x6   :  { %11 = vsyncpa [#allocation4 + $0x1], 0 }
   0x7   :  { %12 = vsyncpa [#allocation7], 0 }
   0x8   :  { %14 = vsyncpa [#allocation7 + $0x1], 0 }
   0x9   :  { %15 = vsyncpa [#allocation5], 0 }
   0xa   :  { %17 = vsyncpa [#allocation5 + $0x1], 0  ;;  %s1429_s15 = smov 0   ;;  %s1431_s16 = smov 0  }
   0xb   :  { %s1433_s17 = smov 0   ;;  %s1435_s18 = smov 0  }
   0xc   :  { %s1437_s19 = smov 0   ;;  %s1439_s20 = smov 0  }
   0xd   :  { %s1441_s21 = smov 0   ;;  %s1443_s22 = smov 0  }
   0xe   :  { %s1445_s23 = smov 0   ;;  %s1447_s24 = smov 0  }
   0xf   :  { %s1449_s25 = smov 0   ;;  %s1451_s26 = smov 0  }
  0x10   :  { %s1453_s27 = smov 0   ;;  %s1455_s28 = smov 0  }
  0x11 LB: > { %1983 = sst [smem:[#allocation14_spill]] %s1351_s18  ;;  %s1500_s29 = sadd.s32 4294967295, %s1391_s28   ;;  %s1391_s28 = sphi %s1455_s28, %s23_s28   ;;  %s1387_s27 = sphi %s1453_s27, %s2052_s27   ;;  %s1383_s26 = sphi %s1451_s26, %s2051_s26   ;;  %s1379_s25 = sphi %s1449_s25, %s2050_s25   ;;  %s1375_s24 = sphi %s1447_s24, %s2049_s24   ;;  %s1371_s23 = sphi %s1445_s23, %s2048_s23   ;;  %s1367_s22 = sphi %s1443_s22, %s2047_s22   ;;  %s1363_s21 = sphi %s1441_s21, %s2046_s21   ;;  %s1359_s20 = sphi %s1439_s20, %s2045_s20   ;;  %s1355_s19 = sphi %s1437_s19, %s2044_s19   ;;  %s1351_s18 = sphi %s1435_s18, %s2037_s18   ;;  %s1347_s17 = sphi %s1433_s17, %s2043_s17   ;;  %s1343_s16 = sphi %s1431_s16, %s2042_s16   ;;  %s1339_s15 = sphi %s1429_s15, %s2041_s15  }
  0x12   : > { %1984 = sst [smem:[#allocation15_spill]] %s1355_s19  ;;  %s844_s30 = sadd.s32 4294967294, %s1391_s28  }
  0x13   : > { %1985 = sst [smem:[#allocation16_spill]] %s1375_s24  ;;  %p1960_p0 = scmp.eq.s32.totalorder %s1391_s28, 0 }
  0x14   : > { %1986 = sst [smem:[#allocation17_spill]] %s1379_s25  ;;  %p1959_p1 = scmp.eq.s32.totalorder %s1500_s29, 0 }
  0x15   : > { %p86_p2 = scmp.ne.s32.totalorder %s1359_s20, %s1355_s19  ;;  %p92_p3 = scmp.ne.s32.totalorder %s1355_s19, %s1351_s18 }
  0x16   : > { %p172_p4 = scmp.eq.s32.totalorder %s1500_s29, 3  ;;  %p178_p5 = scmp.eq.s32.totalorder %s844_s30, 3 }
  0x17   : > { %p88_p6 = por %p86_p2, %p1960_p0  ;;  %p1516_p7 = por %p92_p3, %p1959_p1 }
  0x18   : > { %p1520_p8 = por %p172_p4, %p86_p2  ;;  %p1524_p9 = por %p178_p5, %p92_p3 }
  0x19   : > { %s1987_s7 = scalar_select %p1516_p7, 1, 0 }
  0x1a   : > { %s1989_s8 = scalar_select %p1520_p8, 1, 0 }
  0x1b   : > { %1988 = sst [smem:[#allocation18_spill]] %s1987_s7  ;;  %p1958_p10 = scmp.lt.s32.totalorder %s1391_s28, 4 }
  0x1c   : > { %1990 = sst [smem:[#allocation19_spill]] %s1989_s8  ;;  %s221_s10 = sand.u32 1, %s1391_s28  }
  0x1d   : > { %s1991_s9 = scalar_select %p1524_p9, 1, 0 }
  0x1e   : > { %s223_s11 = sand.u32 1, %s1359_s20   ;;  %s850_s13 = sshll.u32 %s1387_s27, 7 }
  0x1f   : > { %1992 = sst [smem:[#allocation20_spill]] %s1991_s9  ;;  %s849_s12 = sshll.u32 %s223_s11, 7 }
  0x20   : > { %s1993_s1 = sld [smem:[#allocation24_spill]]  ;;  %s225_s5 = scalar_lea.vmem [#allocation6], %s849_s12 }
  0x21   : > { %s234_s18 = sshll.u32 %s225_s5, 4  ;;  %p1539_p11 = pnand %p1958_p10, %p88_p6  ;;  %s1543_s18 = int_to_ptr.vmem [resolvable:$true] %s234_s18 }
  0x22   : > { %s1547_s11 = scalar_lea.sflag [#allocation7], %s221_s10 }
  0x23   : > { %p1149_p3 = pneg %p1539_p11 }
  0x26   : > { %s1535_s6 = scalar_lea.hbm %s1993_s1, %s850_s13  ;;  %s1152_s14 = scalar_lea.hbm %s1993_s1, 4096 }
  0x27   : > { %s1147_s13 = scalar_lea.hbm %s1535_s6, 2048  ;;  %p1153_p6 = scmp.lt.u32.totalorder %s1535_s6, %s1993_s1 }
  0x28   : > { %p1148_p2 = scmp.ne.s32.totalorder %s1535_s6, %s1147_s13  ;;  %p1154_p10 = scmp.lt.u32.totalorder %s1152_s14, %s1147_s13 }
  0x29   : > { %p1156_p0 = scmp.lt.u32.totalorder %s1147_s13, %s1535_s6 }
  0x2a   : > { %p1150_p4 = pnand %p1149_p3, %p1148_p2  ;;  %p1155_p1 = por %p1154_p10, %p1153_p6 }
  0x2c   : > { %p1151_p5 = pneg %p1150_p4  ;;  %p1157_p12 = por %p1156_p0, %p1155_p1 }
  0x2e   : > { %p1158_p13 = pnand %p1157_p12, %p1151_p5 }
  0x30   : > { %1161 = shalt.err (!%p1158_p13)
}
  0x31   : > { %s1162_s10 = scalar_lea.vmem %s1543_s18, 2048  ;;  %s1393_s5 = smov [#allocation6]  }
  0x32   : > { %p1163_p2 = scmp.ne.s32.totalorder %s1543_s18, %s1162_s10  ;;  %s1167_s12 = sshll.u32 %s1393_s5, 4  ;;  %s1168_s12 = int_to_ptr.vmem [resolvable:$false] %s1167_s12 }
  0x33   : > { %s1169_s9 = scalar_lea.vmem %s1168_s12, 4096  ;;  %p1170_p8 = scmp.lt.s32.totalorder %s1543_s18, %s1168_s12 }
  0x34   : > { %p1165_p4 = pnand %p1163_p2, %p1149_p3  ;;  %p1171_p10 = scmp.lt.s32.totalorder %s1169_s9, %s1162_s10 }
  0x36   : > { %p1166_p9 = pneg %p1165_p4  ;;  %p1172_p6 = por %p1171_p10, %p1170_p8 }
  0x38   : > { %p1173_p0 = pnand %p1172_p6, %p1166_p9 }
  0x3a   : > { %1176 = shalt.err (!%p1173_p0)
}
  0x3b   : > { %s1962_s13 = smov 256   ;;  %s1964_s14 = smov 128  }
  0x3c   : > { %s1966_s30 = smov 8   ;;  %p1995_p1 = scmp.lt.s32.totalorder %s1391_s28, 5 }
  0x3d   : > { %1018 = dma.hbm_to_vmem [thread:$0]  (!%p1539_p11), %s1535_s6, 2048, %s1543_s18, %s1547_s11, %s1962_s13, %s1964_s14, %s1966_s30  }
  0x3e   : > { %p1996_p8 = scmp.ge.s32.totalorder %s1391_s28, 1  ;;  %s35_s5 = sadd.s32 1, %s1383_s26 }
  0x3f   : > { %p36_p12 = scmp.ge.s32.totalorder %s35_s5, 2  ;;  %s51_s12 = sadd.s32 1, %s1371_s23 }
  0x40   : > { %p1582_p9 = pnand %p1996_p8, %p1995_p1  ;;  %p58_p13 = scmp.ne.s32.totalorder %s1371_s23, %s1367_s22 }
  0x41   : > { %p64_p3 = scmp.ne.s32.totalorder %s1367_s22, %s1363_s21  ;;  %s2054_s5 = smov (%p36_p12, %s35_s5), 0 }
  0x42   : > { %s1997_s10 = scalar_select %p1582_p9, 1, 0 }
  0x43   : > { %1998 = sst [smem:[#allocation21_spill]] %s2054_s5  ;;  %s1999_s4 = sadd.s32 1, %s1387_s27 }
  0x44   : > { %s2056_s4 = smov (!%p36_p12, %s1999_s4), %s1387_s27  ;;  %s47_s18 = ssub.s32 %s1383_s26, %s2054_s5 }
  0x45   : > { %p2000_p11 = scmp.eq.s32.totalorder %s1391_s28, 0  ;;  %p40_p2 = scmp.ge.s32.totalorder %s2056_s4, 2 }
  0x46   : > { %p49_p4 = scmp.eq.s32.totalorder %s47_s18, 0  ;;  %p2002_p10 = scmp.eq.s32.totalorder %s1500_s29, 0 }
  0x47   : > { %p1601_p5 = por %p2000_p11, %p58_p13  ;;  %s198_s9 = sand.u32 1, %s1371_s23  }
  0x48   : > { %p1607_p6 = por %p2002_p10, %p64_p3  ;;  %s2058_s4 = smov (%p40_p2, %s2056_s4), 0 }
  0x49   : > { %2004 = sst [smem:[#allocation22_spill]] %s2058_s4  ;;  %s75_s14 = ssub.s32 %s1387_s27, %s2058_s4 }
  0x4a   : > { %s2003_s21 = scalar_select %p1607_p6, 1, 0 }
  0x4b   : > { %s1615_s13 = scalar_select %p49_p4, %s1371_s23, %s51_s12  }
  0x4c   : > { %p77_p0 = scmp.eq.s32.totalorder %s75_s14, 0  ;;  %s104_s30 = sor.u32 %s75_s14, %s47_s18 }
  0x4d   : > { %p1619_p1 = scmp.eq.s32.totalorder %s104_s30, 0  ;;  %s847_s5 = sshll.u32 %s198_s9, 7 }
  0x4e   : > { %s2006_s8 = sadd.s32 1, %s1359_s20  ;;  %s848_s3 = sshll.u32 %s1383_s26, 7 }
  0x4f   : > { %s1626_s24 = scalar_select %p77_p0, %s1359_s20, %s2006_s8  }
  0x50   : > { %s2007_s0 = sld [smem:[#allocation23_spill]]  ;;  %s202_s12 = scalar_lea.vmem [#allocation3], %s847_s5 }
  0x51   : > { %s211_s14 = sshll.u32 %s202_s12, 4  ;;  %p2008_p8 = scmp.lt.s32.totalorder %s1391_s28, 4  ;;  %s1634_s14 = int_to_ptr.vmem [resolvable:$true] %s211_s14 }
  0x52   : > { %s1644_s8 = scalar_lea.sflag [#allocation4], %s198_s9 }
  0x53   : > { %p1640_p12 = pnand %p2008_p8, %p1601_p5 }
  0x55   : > { %p1179_p3 = pneg %p1640_p12 }
  0x56   : > { %s1632_s19 = scalar_lea.hbm %s2007_s0, %s848_s3  ;;  %s1182_s5 = scalar_lea.hbm %s2007_s0, 4096 }
  0x57   : > { %s1177_s3 = scalar_lea.hbm %s1632_s19, 2048  ;;  %p1183_p5 = scmp.lt.u32.totalorder %s1632_s19, %s2007_s0 }
  0x58   : > { %p1178_p13 = scmp.ne.s32.totalorder %s1632_s19, %s1177_s3  ;;  %p1184_p4 = scmp.lt.u32.totalorder %s1182_s5, %s1177_s3 }
  0x59   : > { %p1186_p0 = scmp.lt.u32.totalorder %s1177_s3, %s1632_s19 }
  0x5a   : > { %p1180_p11 = pnand %p1179_p3, %p1178_p13  ;;  %p1185_p10 = por %p1184_p4, %p1183_p5 }
  0x5c   : > { %p1181_p2 = pneg %p1180_p11  ;;  %p1187_p8 = por %p1186_p0, %p1185_p10 }
  0x5e   : > { %p1188_p7 = pnand %p1187_p8, %p1181_p2 }
  0x60   : > { %1191 = shalt.err (!%p1188_p7)
}
  0x61   : > { %s1192_s9 = scalar_lea.vmem %s1634_s14, 2048  ;;  %s1397_s12 = smov [#allocation3]  }
  0x62   : > { %p1193_p13 = scmp.ne.s32.totalorder %s1634_s14, %s1192_s9  ;;  %s1197_s25 = sshll.u32 %s1397_s12, 4  ;;  %s1198_s25 = int_to_ptr.vmem [resolvable:$false] %s1197_s25 }
  0x63   : > { %s1199_s7 = scalar_lea.vmem %s1198_s25, 4096  ;;  %p1200_p9 = scmp.lt.s32.totalorder %s1634_s14, %s1198_s25 }
  0x64   : > { %p1195_p11 = pnand %p1193_p13, %p1179_p3  ;;  %p1201_p5 = scmp.lt.s32.totalorder %s1199_s7, %s1192_s9 }
  0x66   : > { %p1196_p6 = pneg %p1195_p11  ;;  %p1202_p4 = por %p1201_p5, %p1200_p9 }
  0x68   : > { %p1203_p10 = pnand %p1202_p4, %p1196_p6 }
  0x6a   : > { %1206 = shalt.err (!%p1203_p10)
}
  0x6b   : > { %s2010_s3 = smov 8   ;;  %s2011_s5 = smov 128  }
  0x6c   : > { %s2012_s18 = smov 256   ;;  %s107_s30 = sadd.s32 1, %s1347_s17 }
  0x6d   : > { %1015 = dma.hbm_to_vmem [thread:$0]  (!%p1640_p12), %s1632_s19, 2048, %s1634_s14, %s1644_s8, %s2012_s18, %s2011_s5, %s2010_s3  }
  0x6e   : > { %s1679_s6 = scalar_select %p1619_p1, %s1347_s17, %s107_s30  }
  0x6f   : > { %p114_p7 = scmp.ne.s32.totalorder %s1347_s17, %s1343_s16  ;;  %p120_p9 = scmp.ne.s32.totalorder %s1343_s16, %s1339_s15 }
  0x70   : > { %s246_s9 = sand.u32 1, %s1347_s17   ;;  %s867_s12 = sshll.u32 %s1383_s26, 5 }
  0x71   : > { %p2013_p6 = scmp.eq.s32.totalorder %s1391_s28, 0  ;;  %p2014_p2 = scmp.eq.s32.totalorder %s1500_s29, 0 }
  0x72   : > { %s851_s7 = sshll.u32 %s246_s9, 7  ;;  %s254_s0 = sadd.s32 %s1387_s27, %s867_s12 }
  0x73   : > { %p116_p3 = por %p114_p7, %p2013_p6  ;;  %p1691_p0 = por %p120_p9, %p2014_p2 }
  0x74   : > { %s854_s4 = sshll.u32 %s254_s0, 7  ;;  %s248_s15 = scalar_lea.vmem [#allocation8], %s851_s7 }
  0x75   : > { %s1699_s1 = scalar_lea.hbm %s1952_s2, %s854_s4  ;;  %s257_s8 = sshll.u32 %s248_s15, 4  ;;  %s1701_s8 = int_to_ptr.vmem [resolvable:$true] %s257_s8 }
  0x76   : > { %p2016_p1 = scmp.lt.s32.totalorder %s1391_s28, 4  ;;  %s1207_s0 = scalar_lea.hbm %s1699_s1, 2048 }
  0x77   : > { %p1208_p8 = scmp.ne.s32.totalorder %s1699_s1, %s1207_s0  ;;  %s1212_s12 = scalar_lea.hbm %s1952_s2, 8192 }
  0x78   : > { %p1705_p12 = pnand %p2016_p1, %p116_p3  ;;  %p1213_p4 = scmp.lt.u32.totalorder %s1699_s1, %s1952_s2 }
  0x79   : > { %p1214_p10 = scmp.lt.u32.totalorder %s1212_s12, %s1207_s0  ;;  %p1216_p9 = scmp.lt.u32.totalorder %s1207_s0, %s1699_s1 }
  0x7a   : > { %p1209_p13 = pneg %p1705_p12 }
  0x7b   : > { %p1215_p7 = por %p1214_p10, %p1213_p4 }
  0x7c   : > { %p1210_p11 = pnand %p1209_p13, %p1208_p8 }
  0x7d   : > { %p1217_p6 = por %p1216_p9, %p1215_p7 }
  0x7e   : > { %p1211_p5 = pneg %p1210_p11 }
  0x80   : > { %p1218_p3 = pnand %p1217_p6, %p1211_p5 }
  0x82   : > { %1221 = shalt.err (!%p1218_p3)
}
  0x83   : > { %s1222_s14 = scalar_lea.vmem %s1701_s8, 2048  ;;  %s1398_s15 = smov [#allocation8]  }
  0x84   : > { %p1223_p2 = scmp.ne.s32.totalorder %s1701_s8, %s1222_s14  ;;  %s1227_s4 = sshll.u32 %s1398_s15, 4  ;;  %s1228_s4 = int_to_ptr.vmem [resolvable:$false] %s1227_s4 }
  0x85   : > { %s1229_s9 = scalar_lea.vmem %s1228_s4, 4096  ;;  %p1230_p11 = scmp.lt.s32.totalorder %s1701_s8, %s1228_s4 }
  0x86   : > { %p1225_p1 = pnand %p1223_p2, %p1209_p13  ;;  %p1231_p4 = scmp.lt.s32.totalorder %s1229_s9, %s1222_s14 }
  0x88   : > { %p1226_p8 = pneg %p1225_p1  ;;  %p1232_p10 = por %p1231_p4, %p1230_p11 }
  0x8a   : > { %p1233_p7 = pnand %p1232_p10, %p1226_p8 }
  0x8c   : > { %1236 = shalt.err (!%p1233_p7)
}
  0x8d   : > { %1021 = dma.hbm_to_vmem [thread:$0]  (!%p1705_p12), %s1699_s1, 2048, %s1701_s8, %s1547_s11, %s2012_s18, %s2011_s5, %s2010_s3  }
  0x8e   : > { %p2018_p13 = scmp.ne.s32.totalorder %s1997_s10, 0 }
  0x8f   : > { %s277_s0 = sand.u32 (!%p2018_p13), 1, %s1367_s22   ;;  %p2019_p5 = scmp.ne.s32.totalorder (!%p2018_p13), %s2003_s21, 0 }
  0x90   : > { %275 = sbr.rel (%p2018_p13) target bundleno = 488 (0x1e8), region = 36  ;;  %s856_s12 = sshll.u32 (!%p2018_p13), %s277_s0, 7 }
  0x91   : > { %s278_s7 = scalar_lea.sflag (!%p2018_p13), [#allocation4], %s277_s0  ;;  %s1741_s19 = scalar_lea.vmem (!%p2018_p13), [#allocation3], %s856_s12 }
  0x97   : > { %1322 = dma.done.wait (%p2019_p5), %s278_s7, 2048  }
  0x98   : > { %1324 = vsyncadd (%p2019_p5), %s278_s7, 4294965248  ;;  %s2020_s30 = sld [smem:[#allocation15_spill]]  ;;  %s2021_s14 = sld [smem:[#allocation18_spill]] }
  0x99   : > { %s286_s11 = sand.u32 1, %s1500_s29  }
  0x9a   : > { %s287_s5 = scalar_lea.sflag [#allocation7], %s286_s11 }
  0x9e   : > { %s288_s3 = sand.u32 1, %s2020_s30   ;;  %p2022_p12 = scmp.ne.s32.totalorder %s2021_s14, 0 }
  0x9f   : > { %s857_s10 = sshll.u32 %s288_s3, 7 }
  0xa0   : > { %s1751_s18 = scalar_lea.vmem [#allocation6], %s857_s10 }
  0xa1   : > { %1326 = dma.done.wait (%p2022_p12), %s287_s5, 2048  }
  0xa2   : > { %1328 = vsyncadd (%p2022_p12), %s287_s5, 4294965248  ;;  %s297_s21 = sand.u32 1, %s1343_s16  }
  0xa3   : > { %s858_s1 = sshll.u32 %s297_s21, 7 }
  0xa4   : > { %s1758_s8 = scalar_lea.vmem [#allocation8], %s858_s1 }
  0xa5   : > { %1330 = dma.done.wait (%p1691_p0), %s287_s5, 2048  }
  0xa6   : > { %1332 = vsyncadd (%p1691_p0), %s287_s5, 4294965248  ;;  %s2023_s29 = sld [smem:[#allocation17_spill]]  ;;  %s2024_s9 = sld [smem:[#allocation25_spill]] }
  0xa7   : > { %s1772_s12 = scalar_lea.vmem [#allocation9], %s857_s10  ;;  %s2025_s7 = sld [smem:[#allocation16_spill]] }
  0xac   : > { %p340_p9 = scmp.lt.s32.totalorder %s2023_s29, 1 }
  0xad   : > { %p860_p6 = scmp.ne.s32.totalorder %s2025_s7, 0 }
  0xae   : > { %s2060_s29 = smov (!%p340_p9, %s2023_s29), 1  ;;  %v1399_v0 = vmov (!%p860_p6), 0.0  }
  0xaf   : > { %s342_s0 = scalar_lea.vmem %s2024_s9, %s2060_s29  ;;  %347 = sbr.rel (%p860_p6) target bundleno = 183 (0xb7), region = 52  ;;  %348 = vst [vmem:[#allocation2] sm:$0xff] (!%p860_p6), %v1399_v0  ;;  %349 = vst [vmem:[#allocation2 + $0x8] sm:$0xff] (!%p860_p6), %v1399_v0 }
  0xb0   : > { %350 = vst [vmem:[#allocation2 + $0x10] sm:$0xff] (!%p860_p6), %v1399_v0  ;;  %351 = vst [vmem:[#allocation2 + $0x18] sm:$0xff] (!%p860_p6), %v1399_v0 }
  0xb1   : > { %352 = vst [vmem:[#allocation2 + $0x20] sm:$0xff] (!%p860_p6), %v1399_v0  ;;  %353 = vst [vmem:[#allocation2 + $0x28] sm:$0xff] (!%p860_p6), %v1399_v0 }
  0xb2   : > { %354 = vst [vmem:[#allocation2 + $0x30] sm:$0xff] (!%p860_p6), %v1399_v0  ;;  %355 = vst [vmem:[#allocation2 + $0x38] sm:$0xff] (!%p860_p6), %v1399_v0 }
  0xb3   : > { %356 = vst [vmem:[#allocation2 + $0x40] sm:$0xff] (!%p860_p6), %v1399_v0  ;;  %357 = vst [vmem:[#allocation2 + $0x48] sm:$0xff] (!%p860_p6), %v1399_v0 }
  0xb4   : > { %358 = vst [vmem:[#allocation2 + $0x50] sm:$0xff] (!%p860_p6), %v1399_v0  ;;  %359 = vst [vmem:[#allocation2 + $0x58] sm:$0xff] (!%p860_p6), %v1399_v0 }
  0xb5   : > { %360 = vst [vmem:[#allocation2 + $0x60] sm:$0xff] (!%p860_p6), %v1399_v0  ;;  %361 = vst [vmem:[#allocation2 + $0x68] sm:$0xff] (!%p860_p6), %v1399_v0 }
  0xb6   : > { %362 = vst [vmem:[#allocation2 + $0x70] sm:$0xff] %v1399_v0  ;;  %363 = vst [vmem:[#allocation2 + $0x78] sm:$0xff] %v1399_v0 }
  0xb7 PF: > { %v396_v1 = vld [vmem:[%s1758_s8] sm:$0xff]  ;;  %v397_v2 = vld [vmem:[%s1758_s8 + $0x8] sm:$0xff]  ;;  %v398_v3 = vld [vmem:[%s1758_s8 + $0x10] sm:$0xff]  ;;  %s2026_s25 = sld [smem:[#allocation16_spill]] }
  0xb8   : > { %v956_v4 = vpack.c.bf16 %v397_v2, %v396_v1  ;;  %v399_v5 = vld [vmem:[%s1758_s8 + $0x18] sm:$0xff]  ;;  %v400_v7 = vld [vmem:[%s1758_s8 + $0x20] sm:$0xff]  ;;  %v401_v8 = vld [vmem:[%s1758_s8 + $0x28] sm:$0xff] }
  0xb9   : > { %v960_v6 = vpack.c.bf16 %v399_v5, %v398_v3  ;;  %v964_v9 = vpack.c.bf16 %v401_v8, %v400_v7  ;;  %v380_v10 = vld [vmem:[%s1741_s19] sm:$0xff]  ;;  %v402_v12 = vld [vmem:[%s1758_s8 + $0x30] sm:$0xff]  ;;  %v403_v13 = vld [vmem:[%s1758_s8 + $0x38] sm:$0xff] }
  0xba   : > { %957 = vmatprep.subr.bf16.mxu0 %v956_v4  ;;  %988 = vmatprep.subr.bf16.mxu1 %v956_v4  ;;  %v388_v11 = vld [vmem:[%s1741_s19 + $0x40] sm:$0xff]  ;;  %v968_v14 = vpack.c.bf16 %v403_v13, %v402_v12  ;;  %v405_v16 = vld [vmem:[%s1758_s8 + $0x48] sm:$0xff]  ;;  %v406_v18 = vld [vmem:[%s1758_s8 + $0x50] sm:$0xff] }
  0xbb   : > { %959 = vmatpush3.bf16.msra.mxu0 %v956_v4  ;;  %996 = vmatpush3.bf16.msra.mxu1 %v956_v4  ;;  %v404_v15 = vld [vmem:[%s1758_s8 + $0x40] sm:$0xff]  ;;  %v407_v19 = vld [vmem:[%s1758_s8 + $0x58] sm:$0xff]  ;;  %v409_v22 = vld [vmem:[%s1758_s8 + $0x68] sm:$0xff] }
  0xbc   : > { %961 = vmatprep.subr.bf16.mxu0 %v960_v6  ;;  %989 = vmatprep.subr.bf16.mxu1 %v960_v6  ;;  %v972_v17 = vpack.c.bf16 %v405_v16, %v404_v15  ;;  %v976_v20 = vpack.c.bf16 %v407_v19, %v406_v18  ;;  %v408_v21 = vld [vmem:[%s1758_s8 + $0x60] sm:$0xff]  ;;  %v410_v24 = vld [vmem:[%s1758_s8 + $0x70] sm:$0xff]  ;;  %v411_v25 = vld [vmem:[%s1758_s8 + $0x78] sm:$0xff] }
  0xbd   : > { %932 = vmatprep.mubr.f32.mxu0 %v380_v10  ;;  %944 = vmatprep.mubr.f32.mxu1 %v388_v11  ;;  %v980_v23 = vpack.c.bf16 %v409_v22, %v408_v21  ;;  %v984_v26 = vpack.c.bf16 %v411_v25, %v410_v24  ;;  %v381_v27 = vld [vmem:[%s1741_s19 + $0x8] sm:$0xff]  ;;  %v382_v29 = vld [vmem:[%s1741_s19 + $0x10] sm:$0xff]  ;;  %v383_v31 = vld [vmem:[%s1741_s19 + $0x18] sm:$0xff]  ;;  %p861_p0 = scmp.ne.s32.totalorder %s2026_s25, 1 }
  0xbe   : > { %v389_v28 = vld [vmem:[%s1741_s19 + $0x48] sm:$0xff]  ;;  %v390_v30 = vld [vmem:[%s1741_s19 + $0x50] sm:$0xff]  ;;  %v391_v32 = vld [vmem:[%s1741_s19 + $0x58] sm:$0xff] }
  0xbf   : > { %963 = vmatpush3.bf16.msra.mxu0 %v960_v6  ;;  %997 = vmatpush3.bf16.msra.mxu1 %v960_v6  ;;  %v384_v33 = vld [vmem:[%s1741_s19 + $0x20] sm:$0xff]  ;;  %v385_v35 = vld [vmem:[%s1741_s19 + $0x28] sm:$0xff]  ;;  %v386_v37 = vld [vmem:[%s1741_s19 + $0x30] sm:$0xff] }
  0xc0   : > { %965 = vmatprep.subr.bf16.mxu0 %v964_v9  ;;  %990 = vmatprep.subr.bf16.mxu1 %v964_v9  ;;  %v392_v34 = vld [vmem:[%s1741_s19 + $0x60] sm:$0xff]  ;;  %v393_v36 = vld [vmem:[%s1741_s19 + $0x68] sm:$0xff]  ;;  %v394_v38 = vld [vmem:[%s1741_s19 + $0x70] sm:$0xff] }
  0xc1   : > { %v387_v39 = vld [vmem:[%s1741_s19 + $0x38] sm:$0xff]  ;;  %v365_v41 = vld [vmem:[#allocation2 + $0x8] sm:$0xff]  ;;  %v364_v43 = vld [vmem:[#allocation2] sm:$0xff] }
  0xc2   : > { %v395_v40 = vld [vmem:[%s1741_s19 + $0x78] sm:$0xff]  ;;  %v373_v42 = vld [vmem:[#allocation2 + $0x48] sm:$0xff]  ;;  %v372_v44 = vld [vmem:[#allocation2 + $0x40] sm:$0xff] }
  0xc3   : > { %967 = vmatpush3.bf16.msra.mxu0 %v964_v9  ;;  %998 = vmatpush3.bf16.msra.mxu1 %v964_v9  ;;  %v367_v53 = vld [vmem:[#allocation2 + $0x18] sm:$0xff]  ;;  %v366_v55 = vld [vmem:[#allocation2 + $0x10] sm:$0xff]  ;;  %v369_v1 = vld [vmem:[#allocation2 + $0x28] sm:$0xff] }
  0xc4   : > { %969 = vmatprep.subr.bf16.mxu0 %v968_v14  ;;  %991 = vmatprep.subr.bf16.mxu1 %v968_v14  ;;  %v375_v54 = vld [vmem:[#allocation2 + $0x58] sm:$0xff]  ;;  %v374_v56 = vld [vmem:[#allocation2 + $0x50] sm:$0xff]  ;;  %v377_v2 = vld [vmem:[#allocation2 + $0x68] sm:$0xff] }
  0xc5   : > { %v368_v3 = vld [vmem:[#allocation2 + $0x20] sm:$0xff]  ;;  %v371_v13 = vld [vmem:[#allocation2 + $0x38] sm:$0xff]  ;;  %v370_v15 = vld [vmem:[#allocation2 + $0x30] sm:$0xff] }
  0xc6   : > { %v376_v4 = vld [vmem:[#allocation2 + $0x60] sm:$0xff]  ;;  %v378_v16 = vld [vmem:[#allocation2 + $0x70] sm:$0xff] }
  0xc7   : > { %971 = vmatpush3.bf16.msra.mxu0 %v968_v14  ;;  %999 = vmatpush3.bf16.msra.mxu1 %v968_v14  ;;  %v379_v14 = vld [vmem:[#allocation2 + $0x78] sm:$0xff] }
  0xc8   : > { %973 = vmatprep.subr.bf16.mxu0 %v972_v17  ;;  %992 = vmatprep.subr.bf16.mxu1 %v972_v17 }
  0xcb   : > { %975 = vmatpush3.bf16.msra.mxu0 %v972_v17  ;;  %1000 = vmatpush3.bf16.msra.mxu1 %v972_v17 }
  0xcc   : > { %977 = vmatprep.subr.bf16.mxu0 %v976_v20  ;;  %993 = vmatprep.subr.bf16.mxu1 %v976_v20 }
  0xcf   : > { %979 = vmatpush3.bf16.msra.mxu0 %v976_v20  ;;  %1001 = vmatpush3.bf16.msra.mxu1 %v976_v20 }
  0xd0   : > { %981 = vmatprep.subr.bf16.mxu0 %v980_v23  ;;  %994 = vmatprep.subr.bf16.mxu1 %v980_v23 }
  0xd3   : > { %983 = vmatpush3.bf16.msra.mxu0 %v980_v23  ;;  %1002 = vmatpush3.bf16.msra.mxu1 %v980_v23 }
  0xd4   : > { %985 = vmatprep.subr.bf16.mxu0 %v984_v26  ;;  %995 = vmatprep.subr.bf16.mxu1 %v984_v26 }
  0xd7   : > { %987 = vmatpush3.bf16.msra.mxu0 %v984_v26  ;;  %1003 = vmatpush3.bf16.msra.mxu1 %v984_v26  ;;  %v1813_v26 = vld [vmem:[%s342_s0] ss:$0 sm:$0xff] (!%p861_p0) }
  0xda   : > { %933 = vmatmul.mubr.f32.vlgmr.msra.gmra.mrb[0].mxu0 %v381_v27  ;;  %945 = vmatmul.mubr.f32.vlgmr.msra.gmra.mrb[0].mxu1 %v389_v28  ;;  %v632_v27 = vld [vmem:[%s1751_s18] sm:$0xff] (!%p861_p0) }
  0xdb   : > { %935 = vmatprep.mubr.f32.mxu0 %v382_v29  ;;  %947 = vmatprep.mubr.f32.mxu1 %v390_v30  ;;  %v633_v30 = vld [vmem:[%s1751_s18 + $0x8] sm:$0xff] (!%p861_p0) }
  0xde   : > { %936 = vmatmul.mubr.f32.gmra.mrb[2].mxu0 %v383_v31  ;;  %948 = vmatmul.mubr.f32.gmra.mrb[2].mxu1 %v391_v32 }
  0xdf   : > { %938 = vmatprep.mubr.f32.mxu0 %v384_v33  ;;  %950 = vmatprep.mubr.f32.mxu1 %v392_v34  ;;  %v634_v34 = vld [vmem:[%s1751_s18 + $0x10] sm:$0xff] (!%p861_p0) }
  0xe2   : > { %939 = vmatmul.mubr.f32.gmra.mrb[4].mxu0 %v385_v35  ;;  %951 = vmatmul.mubr.f32.gmra.mrb[4].mxu1 %v393_v36  ;;  %v635_v36 = vld [vmem:[%s1751_s18 + $0x18] sm:$0xff] (!%p861_p0) }
  0xe3   : > { %941 = vmatprep.mubr.f32.mxu0 %v386_v37  ;;  %953 = vmatprep.mubr.f32.mxu1 %v394_v38 }
  0xe6   : > { %942 = vmatmul.mubr.f32.gmra.mrb[6].mxu0 %v387_v39  ;;  %954 = vmatmul.mubr.f32.gmra.mrb[6].mxu1 %v395_v40  ;;  %v636_v40 = vld [vmem:[%s1751_s18 + $0x20] sm:$0xff] (!%p861_p0) }
 0x1ad   : > { %v934_v45 = vpop.f32.mrb[0].mxu0  ;;  %v946_v46 = vpop.f32.mrb[0].mxu1 }
 0x1ae   : > { %v558_v47 = vadd.f32 %v934_v45, %v365_v41  ;;  %v566_v48 = vadd.f32 %v946_v46, %v373_v42  ;;  %v478_v49 = vpop.f32.mrb[1].mxu0  ;;  %v518_v50 = vpop.f32.mrb[1].mxu1  ;;  %v637_v46 = vld [vmem:[%s1751_s18 + $0x28] sm:$0xff] (!%p861_p0) }
 0x1af   : > { %v557_v51 = vadd.f32 %v478_v49, %v364_v43  ;;  %v565_v52 = vadd.f32 %v518_v50, %v372_v44 }
 0x1b0   : > { %574 = vst [vmem:[#allocation2 + $0x8] sm:$0xff] %v558_v47  ;;  %582 = vst [vmem:[#allocation2 + $0x48] sm:$0xff] %v566_v48  ;;  %v638_v48 = vld [vmem:[%s1751_s18 + $0x30] sm:$0xff] (!%p861_p0) }
 0x1b1   : > { %573 = vst [vmem:[#allocation2] sm:$0xff] %v557_v51  ;;  %581 = vst [vmem:[#allocation2 + $0x40] sm:$0xff] %v565_v52  ;;  %v937_v57 = vpop.f32.mrb[2].mxu0  ;;  %v949_v58 = vpop.f32.mrb[2].mxu1  ;;  %v639_v52 = vld [vmem:[%s1751_s18 + $0x38] sm:$0xff] (!%p861_p0) }
 0x1b2   : > { %v560_v59 = vadd.f32 %v937_v57, %v367_v53  ;;  %v568_v60 = vadd.f32 %v949_v58, %v375_v54  ;;  %v488_v61 = vpop.f32.mrb[3].mxu0  ;;  %v528_v62 = vpop.f32.mrb[3].mxu1  ;;  %v640_v58 = vld [vmem:[%s1751_s18 + $0x40] sm:$0xff] (!%p861_p0) }
 0x1b3   : > { %v559_v63 = vadd.f32 %v488_v61, %v366_v55  ;;  %v567_v0 = vadd.f32 %v528_v62, %v374_v56 }
 0x1b4   : > { %576 = vst [vmem:[#allocation2 + $0x18] sm:$0xff] %v560_v59  ;;  %584 = vst [vmem:[#allocation2 + $0x58] sm:$0xff] %v568_v60  ;;  %v641_v60 = vld [vmem:[%s1751_s18 + $0x48] sm:$0xff] (!%p861_p0) }
 0x1b5   : > { %575 = vst [vmem:[#allocation2 + $0x10] sm:$0xff] %v559_v63  ;;  %583 = vst [vmem:[#allocation2 + $0x50] sm:$0xff] %v567_v0  ;;  %v940_v5 = vpop.f32.mrb[4].mxu0  ;;  %v952_v6 = vpop.f32.mrb[4].mxu1  ;;  %v642_v0 = vld [vmem:[%s1751_s18 + $0x50] sm:$0xff] (!%p861_p0) }
 0x1b6   : > { %v562_v7 = vadd.f32 %v940_v5, %v369_v1  ;;  %v570_v8 = vadd.f32 %v952_v6, %v377_v2  ;;  %v498_v9 = vpop.f32.mrb[5].mxu0  ;;  %v538_v10 = vpop.f32.mrb[5].mxu1  ;;  %v643_v6 = vld [vmem:[%s1751_s18 + $0x58] sm:$0xff] (!%p861_p0) }
 0x1b7   : > { %v561_v11 = vadd.f32 %v498_v9, %v368_v3  ;;  %v569_v12 = vadd.f32 %v538_v10, %v376_v4  ;;  %592 = sbr.rel (%p861_p0) target bundleno = 459 (0x1cb), region = 56  ;;  %v594_v29 = vld [vmem:[#allocation2 + $0x8] sm:$0xff] (!%p861_p0) }
 0x1b8   : > { %578 = vst [vmem:[#allocation2 + $0x28] sm:$0xff] %v562_v7  ;;  %586 = vst [vmem:[#allocation2 + $0x68] sm:$0xff] %v570_v8  ;;  %v593_v25 = vld [vmem:[#allocation2] sm:$0xff] (!%p861_p0)  ;;  %v617_v32 = vadd.f32 (!%p861_p0), %v1813_v26, %v594_v29  ;;  %v602_v59 = vld [vmem:[#allocation2 + $0x48] sm:$0xff] (!%p861_p0) }
 0x1b9   : > { %577 = vst [vmem:[#allocation2 + $0x20] sm:$0xff] %v561_v11  ;;  %585 = vst [vmem:[#allocation2 + $0x60] sm:$0xff] %v569_v12  ;;  %v943_v17 = vpop.f32.mrb[6].mxu0  ;;  %v955_v18 = vpop.f32.mrb[6].mxu1  ;;  %v616_v28 = vadd.f32 (!%p861_p0), %v1813_v26, %v593_v25  ;;  %v601_v53 = vld [vmem:[#allocation2 + $0x40] sm:$0xff] (!%p861_p0)  ;;  %v625_v62 = vadd.f32 (!%p861_p0), %v1813_v26, %v602_v59  ;;  %v645_v12 = vld [vmem:[%s1751_s18 + $0x68] sm:$0xff] (!%p861_p0) }
 0x1ba   : > { %v564_v19 = vadd.f32 %v943_v17, %v371_v13  ;;  %v572_v20 = vadd.f32 %v955_v18, %v379_v14  ;;  %v508_v21 = vpop.f32.mrb[7].mxu0  ;;  %v548_v22 = vpop.f32.mrb[7].mxu1  ;;  %v649_v42 = vadd.f32 (!%p861_p0), %v633_v30, %v617_v32  ;;  %v624_v57 = vadd.f32 (!%p861_p0), %v1813_v26, %v601_v53  ;;  %v644_v8 = vld [vmem:[%s1751_s18 + $0x60] sm:$0xff] (!%p861_p0)  ;;  %v646_v18 = vld [vmem:[%s1751_s18 + $0x70] sm:$0xff] (!%p861_p0) }
 0x1bb   : > { %v563_v23 = vadd.f32 %v508_v21, %v370_v15  ;;  %v571_v24 = vadd.f32 %v548_v22, %v378_v16  ;;  %v596_v35 = vld [vmem:[#allocation2 + $0x18] sm:$0xff] (!%p861_p0)  ;;  %v648_v37 = vadd.f32 (!%p861_p0), %v632_v27, %v616_v28  ;;  %v657_v9 = vadd.f32 (!%p861_p0), %v641_v60, %v625_v62 }
 0x1bc   : > { %580 = vst [vmem:[#allocation2 + $0x38] sm:$0xff] %v564_v19  ;;  %588 = vst [vmem:[#allocation2 + $0x78] sm:$0xff] %v572_v20  ;;  %v595_v31 = vld [vmem:[#allocation2 + $0x10] sm:$0xff] (!%p861_p0)  ;;  %v619_v38 = vadd.f32 (!%p861_p0), %v1813_v26, %v596_v35  ;;  %v604_v1 = vld [vmem:[#allocation2 + $0x58] sm:$0xff] (!%p861_p0)  ;;  %v656_v3 = vadd.f32 (!%p861_p0), %v640_v58, %v624_v57 }
 0x1bd   : > { %579 = vst [vmem:[#allocation2 + $0x30] sm:$0xff] %v563_v23  ;;  %587 = vst [vmem:[#allocation2 + $0x70] sm:$0xff] %v571_v24  ;;  %v618_v33 = vadd.f32 (!%p861_p0), %v1813_v26, %v595_v31  ;;  %v603_v63 = vld [vmem:[#allocation2 + $0x50] sm:$0xff] (!%p861_p0)  ;;  %v627_v5 = vadd.f32 (!%p861_p0), %v1813_v26, %v604_v1  ;;  %v647_v20 = vld [vmem:[%s1751_s18 + $0x78] sm:$0xff] (!%p861_p0) }
 0x1be   : > { %664 = vst [vmem:[%s1772_s12] sm:$0xff] %v648_v37  ;;  %v651_v49 = vadd.f32 %v635_v36, %v619_v38  ;;  %665 = vst [vmem:[%s1772_s12 + $0x8] sm:$0xff] %v649_v42  ;;  %v626_v4 = vadd.f32 %v1813_v26, %v603_v63 }
 0x1bf   : > { %v598_v41 = vld [vmem:[#allocation2 + $0x28] sm:$0xff]  ;;  %v650_v43 = vadd.f32 %v634_v34, %v618_v33  ;;  %672 = vst [vmem:[%s1772_s12 + $0x40] sm:$0xff] %v656_v3  ;;  %v659_v15 = vadd.f32 %v643_v6, %v627_v5  ;;  %673 = vst [vmem:[%s1772_s12 + $0x48] sm:$0xff] %v657_v9 }
 0x1c0   : > { %v597_v39 = vld [vmem:[#allocation2 + $0x20] sm:$0xff]  ;;  %v621_v45 = vadd.f32 %v1813_v26, %v598_v41  ;;  %667 = vst [vmem:[%s1772_s12 + $0x18] sm:$0xff] %v651_v49  ;;  %v606_v11 = vld [vmem:[#allocation2 + $0x68] sm:$0xff]  ;;  %v658_v14 = vadd.f32 %v642_v0, %v626_v4 }
 0x1c1   : > { %v620_v44 = vadd.f32 %v1813_v26, %v597_v39  ;;  %666 = vst [vmem:[%s1772_s12 + $0x10] sm:$0xff] %v650_v43  ;;  %v605_v7 = vld [vmem:[#allocation2 + $0x60] sm:$0xff]  ;;  %v629_v16 = vadd.f32 %v1813_v26, %v606_v11  ;;  %675 = vst [vmem:[%s1772_s12 + $0x58] sm:$0xff] %v659_v15 }
 0x1c2   : > { %v653_v55 = vadd.f32 %v637_v46, %v621_v45  ;;  %v628_v10 = vadd.f32 %v1813_v26, %v605_v7  ;;  %674 = vst [vmem:[%s1772_s12 + $0x50] sm:$0xff] %v658_v14 }
 0x1c3   : > { %v600_v51 = vld [vmem:[#allocation2 + $0x38] sm:$0xff]  ;;  %v652_v54 = vadd.f32 %v636_v40, %v620_v44  ;;  %v661_v23 = vadd.f32 %v645_v12, %v629_v16 }
 0x1c4   : > { %v599_v47 = vld [vmem:[#allocation2 + $0x30] sm:$0xff]  ;;  %v623_v56 = vadd.f32 %v1813_v26, %v600_v51  ;;  %669 = vst [vmem:[%s1772_s12 + $0x28] sm:$0xff] %v653_v55  ;;  %v608_v19 = vld [vmem:[#allocation2 + $0x78] sm:$0xff]  ;;  %v660_v21 = vadd.f32 %v644_v8, %v628_v10 }
 0x1c5   : > { %v622_v50 = vadd.f32 %v1813_v26, %v599_v47  ;;  %668 = vst [vmem:[%s1772_s12 + $0x20] sm:$0xff] %v652_v54  ;;  %v607_v13 = vld [vmem:[#allocation2 + $0x70] sm:$0xff]  ;;  %v631_v22 = vadd.f32 %v1813_v26, %v608_v19  ;;  %677 = vst [vmem:[%s1772_s12 + $0x68] sm:$0xff] %v661_v23 }
 0x1c6   : > { %v655_v2 = vadd.f32 %v639_v52, %v623_v56  ;;  %v630_v17 = vadd.f32 %v1813_v26, %v607_v13  ;;  %676 = vst [vmem:[%s1772_s12 + $0x60] sm:$0xff] %v660_v21 }
 0x1c7   : > { %v654_v61 = vadd.f32 %v638_v48, %v622_v50  ;;  %v663_v25 = vadd.f32 %v647_v20, %v631_v22 }
 0x1c8   : > { %671 = vst [vmem:[%s1772_s12 + $0x38] sm:$0xff] %v655_v2  ;;  %v662_v24 = vadd.f32 %v646_v18, %v630_v17 }
 0x1c9   : > { %670 = vst [vmem:[%s1772_s12 + $0x30] sm:$0xff] %v654_v61  ;;  %679 = vst [vmem:[%s1772_s12 + $0x78] sm:$0xff] %v663_v25 }
 0x1ca   : > { %678 = vst [vmem:[%s1772_s12 + $0x70] sm:$0xff] %v662_v24 }
 0x1cb PF: > { %s2028_s11 = sld [smem:[#allocation17_spill]]  ;;  %s2030_s5 = sld [smem:[#allocation19_spill]] }
 0x1cc   : > { %s2031_s8 = sld [smem:[#allocation26_spill]]  ;;  %s696_s15 = sshll.u32 %s1772_s12, 4  ;;  %s1870_s15 = int_to_ptr.vmem [resolvable:$true] %s696_s15 }
 0x1cd   : > { %s1874_s4 = scalar_lea.sflag [#allocation5], %s288_s3  ;;  %s1237_s9 = scalar_lea.vmem %s1870_s15, 2048 }
 0x1ce   : > { %p1238_p3 = scmp.ne.s32.totalorder %s1870_s15, %s1237_s9  ;;  %s1400_s0 = smov [#allocation9]  }
 0x1cf   : > { %s1241_s7 = sshll.u32 %s1400_s0, 4  ;;  %s1242_s7 = int_to_ptr.vmem [resolvable:$false] %s1241_s7 }
 0x1d0   : > { %s1243_s25 = scalar_lea.vmem %s1242_s7, 4096  ;;  %p1244_p11 = scmp.lt.s32.totalorder %s1870_s15, %s1242_s7 }
 0x1d1   : > { %s864_s21 = sshll.u32 %s2028_s11, 7  ;;  %p2032_p2 = scmp.ne.s32.totalorder %s2030_s5, 0 }
 0x1d2   : > { %s1867_s29 = scalar_lea.hbm %s2031_s8, %s864_s21  ;;  %p1245_p4 = scmp.lt.s32.totalorder %s1243_s25, %s1237_s9 }
 0x1d3   : > { %p1239_p1 = pnand %p1238_p3, %p2032_p2 }
 0x1d4   : > { %p1246_p10 = por %p1245_p4, %p1244_p11 }
 0x1d5   : > { %p1240_p8 = pneg %p1239_p1 }
 0x1d7   : > { %p1247_p7 = pnand %p1246_p10, %p1240_p8 }
 0x1d9   : > { %1250 = shalt.err (!%p1247_p7)
}
 0x1da   : > { %s1251_s3 = scalar_lea.hbm %s1867_s29, 2048  ;;  %s1255_s30 = scalar_lea.hbm %s2031_s8, 4096 }
 0x1db   : > { %p1252_p13 = scmp.ne.s32.totalorder %s1867_s29, %s1251_s3  ;;  %p1256_p9 = scmp.lt.u32.totalorder %s1867_s29, %s2031_s8 }
 0x1dc   : > { %p1257_p6 = scmp.lt.u32.totalorder %s1255_s30, %s1251_s3  ;;  %p1259_p3 = scmp.lt.u32.totalorder %s1251_s3, %s1867_s29 }
 0x1dd   : > { %p1253_p5 = pnand %p1252_p13, %p2032_p2 }
 0x1de   : > { %p1258_p0 = por %p1257_p6, %p1256_p9 }
 0x1df   : > { %p1254_p12 = pneg %p1253_p5 }
 0x1e0   : > { %p1260_p1 = por %p1259_p3, %p1258_p0 }
 0x1e2   : > { %p1261_p8 = pnand %p1260_p1, %p1254_p12 }
 0x1e4   : > { %1264 = shalt.err (!%p1261_p8)
}
 0x1e5   : > { %s1401_s10 = smov 128   ;;  %s1402_s21 = smov 256  }
 0x1e6   : > { %s1403_s18 = smov 8  }
 0x1e7   : > { %1010 = dma.vmem_to_hbm [thread:$0]  (%p2032_p2), %s1870_s15, 2048, %s1867_s29, %s1874_s4, %s1401_s10, %s1402_s21, %s1403_s18  }
 0x1e8 PF: > { %s2033_s1 = sld [smem:[#allocation14_spill]]  ;;  %s2034_s9 = sld [smem:[#allocation20_spill]] }
 0x1e9   : > { %p1027_p11 = scmp.ge.s32.totalorder %s1391_s28, 2 }
 0x1ee   : > { %s711_s0 = sand.u32 1, %s2033_s1   ;;  %p2035_p4 = scmp.ne.s32.totalorder %s2034_s9, 0 }
 0x1ef   : > { %s712_s7 = scalar_lea.sflag [#allocation5], %s711_s0 }
 0x1f0   : > { %p1023_p10 = pnand %p1027_p11, %p2035_p4 }
 0x1f2   : > { %1334 = dma.done.wait (!%p1023_p10), %s712_s7, 2048  }
 0x1f3   : > { %1336 = vsyncadd (!%p1023_p10), %s712_s7, 4294965248  ;;  %s23_s28 = sadd.s32 1, %s1391_s28   ;;  %s2037_s18 = sld [smem:[#allocation15_spill]] }
 0x1f4   : > { %p1903_p7 = scmp.ge.s32.totalorder %s23_s28, 6   ;;  %s2038_s5 = sld [smem:[#allocation21_spill]] }
 0x1f5   : > { %s2039_s29 = sld [smem:[#allocation22_spill]]  ;;  %s2041_s15 = smov %s1343_s16 }
 0x1f6   : > { %s2042_s16 = smov %s1347_s17  ;;  %s2043_s17 = smov %s1679_s6 }
 0x1f7   : > { %s2044_s19 = smov %s1359_s20  ;;  %s2045_s20 = smov %s1626_s24 }
 0x1f8   : > { %s2046_s21 = smov %s1367_s22  ;;  %s2047_s22 = smov %s1371_s23 }
 0x1f9   : > { %s2048_s23 = smov %s1615_s13  ;;  %s2049_s24 = smov %s1383_s26 }
 0x1fa   : > { %s2050_s25 = smov %s1387_s27  ;;  %s2051_s26 = smov %s2038_s5 }
 0x1fb   : > { %s2052_s27 = smov %s2039_s29  ;;  %22 = sbr.rel (!%p1903_p7) target bundleno = 17 (0x11), region = 116 }
 0x202   :  { %717 = vsyncpa [#allocation4], 1 }
 0x203   :  { %719 = vsyncpa [#allocation4 + $0x1], 1 }
 0x204   :  { %720 = vsyncpa [#allocation7], 1 }
 0x205   :  { %722 = vsyncpa [#allocation7 + $0x1], 1 }
 0x206   :  { %723 = vsyncpa [#allocation5], 1 }
 0x207   :  { %725 = vsyncpa [#allocation5 + $0x1], 1 }

</bundles_post_ra>
